<compile_context>
chip_gen: v7x
topology: tpu7x:2x2x1
jax: 0.10.0
libtpu: 0.0.40
codegen_flags: <defaults>
</compile_context>

<pallas_src>
import math
import functools

import jax
import jax.numpy as jnp
from jax import lax
from jax.experimental import pallas as pl
from jax.experimental.pallas import tpu as pltpu

_GELU_C = math.sqrt(2.0 / math.pi)
_LANE = 128
_SUBLANE = 8


def _round_up(v, m):
    return ((v + m - 1) // m) * m


@functools.lru_cache(maxsize=None)
def _tpu_defaults():
    kind = ""
    try:
        kind = jax.devices()[0].device_kind.lower()
    except Exception:
        pass
    is_v5e = ("v5 lite" in kind) or ("v5e" in kind)
    num_tc = 2 if "v7" in kind else 1
    try:
        vmem_cap = int(pltpu.get_tpu_info().vmem_capacity_bytes)
    except Exception:
        vmem_cap = (64 << 20) if "v7" in kind else (128 << 20)
    frac = 0.70 if vmem_cap <= (64 << 20) else 0.78   # ~45 MiB on v7x, ~100 MiB on v5e/v6e
    return {
        "kind": kind,
        "is_v5e": is_v5e,
        "num_tc": num_tc,
        "vmem_limit": int(vmem_cap * frac),
        "default_bm": 256 if num_tc > 1 else 512,
    }


@functools.lru_cache(maxsize=None)
def _buffered_supported():
    """One-time capability probe for BlockSpec(pipeline_mode=pl.Buffered(1))."""
    def _copy(x_ref, o_ref):
        o_ref[...] = x_ref[...]
    try:
        x = jnp.zeros((8, 128), jnp.float32)
        out = pl.pallas_call(
            _copy,
            out_shape=jax.ShapeDtypeStruct((8, 128), jnp.float32),
            grid=(1,),
            in_specs=[pl.BlockSpec((8, 128), lambda i: (0, 0),
                                   pipeline_mode=pl.Buffered(1))],
            out_specs=pl.BlockSpec((8, 128), lambda i: (0, 0)),
        )(x)
        jax.block_until_ready(out)
        return True
    except Exception:
        return False


def prepare_ffn_params(gamma, beta, w1, b1, w2, b2, *,
                       matmul_dtype=jnp.bfloat16, hidden_chunk=512):
    """One-time weight preparation (lane-dense padding, dtype cast, hidden chunking).

    Shapes (x @ W convention):
      gamma, beta: (in_dim,)              LayerNorm affine
      w1: (in_dim, hidden),  b1: (hidden,)
      w2: (hidden, out_dim), b2: (out_dim,)
    """
    in_dim, hidden = w1.shape
    out_dim = w2.shape[1]
    assert w2.shape[0] == hidden

    h_pad128 = _round_up(hidden, _LANE)
    n_chunks = max(1, -(-h_pad128 // _round_up(hidden_chunk, _LANE)))
    h_chunk = _round_up(-(-h_pad128 // n_chunks), _LANE)
    h_pad = n_chunks * h_chunk
    o_pad = _round_up(out_dim, _LANE)

    w1p = jnp.pad(w1, ((0, 0), (0, h_pad - hidden))).astype(matmul_dtype)
    w1p = w1p.reshape(in_dim, n_chunks, h_chunk).transpose(1, 0, 2)       # (nc, in, hc)
    b1p = jnp.pad(b1, (0, h_pad - hidden)).astype(jnp.float32)
    b1p = b1p.reshape(n_chunks, 1, h_chunk)                               # (nc, 1, hc)
    w2p = jnp.pad(w2, ((0, h_pad - hidden), (0, o_pad - out_dim))).astype(matmul_dtype)
    w2p = w2p.reshape(n_chunks, h_chunk, o_pad)                           # (nc, hc, op)
    b2p = jnp.pad(b2, (0, o_pad - out_dim)).astype(jnp.float32).reshape(1, o_pad)

    return {
        "gamma": jnp.asarray(gamma, jnp.float32).reshape(1, in_dim),
        "beta": jnp.asarray(beta, jnp.float32).reshape(1, in_dim),
        "w1": w1p, "b1": b1p, "w2": w2p, "b2": b2p,
        "in_dim": in_dim, "hidden": hidden, "out_dim": out_dim,
        "h_pad": h_pad, "o_pad": o_pad, "h_chunk": h_chunk, "n_chunks": n_chunks,
    }


def _ffn_kernel(x_ref, gamma_ref, beta_ref, w1_ref, b1_ref, w2_ref, b2_ref,
                o_ref, *, gelu_dtype):
    # ---- LayerNorm (eps = 1e-6) in f32; x block carries the full feature dim,
    # so no lane masking is needed for the statistics. ----
    xf = x_ref[...].astype(jnp.float32)                       # (bm, in_dim)
    mu = jnp.mean(xf, axis=-1, keepdims=True)
    xc = xf - mu
    var = jnp.mean(xc * xc, axis=-1, keepdims=True)
    xn = xc * lax.rsqrt(var + jnp.float32(1e-6))
    xn = xn * gamma_ref[...].astype(jnp.float32) + beta_ref[...].astype(jnp.float32)
    xn = xn.astype(w1_ref.dtype)                              # MXU operand dtype (bf16 default)

    bm = xf.shape[0]
    n_chunks = w1_ref.shape[0]
    o_pad = o_ref.shape[-1]

    def one_chunk(w1c, b1c, w2c, acc):
        # Linear(in -> hidden chunk), f32 accumulation on the MXU.
        h = jnp.dot(xn, w1c, preferred_element_type=jnp.float32)
        h = h + b1c.astype(jnp.float32)
        # GELU (tanh approximation; matches the module's custom GELU).
        h = h.astype(gelu_dtype)
        h = 0.5 * h * (1.0 + jnp.tanh(_GELU_C * (h + 0.044715 * h * h * h)))
        # (Dropout: identity in eval mode.)
        # Linear(hidden chunk -> out), accumulated in f32.
        return acc + jnp.dot(h.astype(w2c.dtype), w2c,
                             preferred_element_type=jnp.float32)

    acc0 = jnp.zeros((bm, o_pad), jnp.float32)
    if n_chunks == 1:
        acc = one_chunk(w1_ref[0], b1_ref[0], w2_ref[0], acc0)
    else:
        def body(ci, acc):
            return one_chunk(w1_ref[ci], b1_ref[ci], w2_ref[ci], acc)
        acc = lax.fori_loop(0, n_chunks, body, acc0)

    acc = acc + b2_ref[...].astype(jnp.float32)
    o_ref[...] = acc.astype(o_ref.dtype)


def _choose_block_m(n, requested, num_tc):
    bm = min(requested, _round_up(max(n, 1), _SUBLANE))
    if num_tc > 1:
        # keep every TensorCore fed when there is enough work (v7x has 2 TCs)
        while bm > 128 and pl.cdiv(n, bm) < 2 * num_tc:
            bm //= 2
    return max(bm, _SUBLANE)


def _vmem_estimate(bm, in_dim, h_pad, h_chunk, o_pad, x_isz, w_isz, out_isz,
                   weight_buffers):
    d_lane = _round_up(in_dim, _LANE)
    weight_bytes = ((in_dim * h_pad + h_pad * o_pad) * w_isz
                    + (h_pad + o_pad + 2 * d_lane) * 4)
    act_bytes = 2 * bm * d_lane * x_isz + 2 * bm * o_pad * out_isz   # double-buffered tiles
    scratch_bytes = 2 * bm * (d_lane + h_chunk + o_pad) * 4          # xn / h chunk / acc
    return weight_buffers * weight_bytes + act_bytes + scratch_bytes


def feed_forward(x, params, *, block_m=None, gelu_dtype=None):
    """x: (..., in_dim) -> (..., out_dim).  Fused LayerNorm + MLP (GELU) kernel.

    `params` comes from prepare_ffn_params() (weights pre-padded / pre-cast once).
    """
    in_dim = params["in_dim"]
    out_dim = params["out_dim"]
    o_pad = params["o_pad"]
    h_pad = params["h_pad"]
    h_chunk = params["h_chunk"]
    n_chunks = params["n_chunks"]

    orig_shape = x.shape
    assert orig_shape[-1] == in_dim, (orig_shape, in_dim)
    x2 = x.reshape(-1, in_dim)
    n = x2.shape[0]

    hw = _tpu_defaults()
    if block_m is None:
        block_m = hw["default_bm"]
    bm = _choose_block_m(n, block_m, hw["num_tc"])

    w_dtype = params["w1"].dtype
    if gelu_dtype is None:
        gelu_dtype = (jnp.bfloat16
                      if (w_dtype == jnp.bfloat16 and not hw["is_v5e"])
                      else jnp.float32)

    weight_buffers = 1 if _buffered_supported() else 2
    x_isz = jnp.dtype(x.dtype).itemsize
    w_isz = jnp.dtype(w_dtype).itemsize

    # Shrink the token tile until the per-step VMEM footprint fits the budget.
    while bm > 64 and _vmem_estimate(bm, in_dim, h_pad, h_chunk, o_pad,
                                     x_isz, w_isz, x_isz,
                                     weight_buffers) > 0.9 * hw["vmem_limit"]:
        bm //= 2
    # TODO(synk): if the (single-buffered) weights alone exceed the VMEM budget,
    # tile them over a second grid axis instead of only shrinking bm.

    grid = (pl.cdiv(n, bm),)

    const_kw = {"pipeline_mode": pl.Buffered(1)} if weight_buffers == 1 else {}
    in_specs = [
        pl.BlockSpec((bm, in_dim), lambda i: (i, 0)),                              # x tile
        pl.BlockSpec((1, in_dim), lambda i: (0, 0), **const_kw),                   # gamma
        pl.BlockSpec((1, in_dim), lambda i: (0, 0), **const_kw),                   # beta
        pl.BlockSpec((n_chunks, in_dim, h_chunk), lambda i: (0, 0, 0), **const_kw),  # W1
        pl.BlockSpec((n_chunks, 1, h_chunk), lambda i: (0, 0, 0), **const_kw),       # b1
        pl.BlockSpec((n_chunks, h_chunk, o_pad), lambda i: (0, 0, 0), **const_kw),   # W2
        pl.BlockSpec((1, o_pad), lambda i: (0, 0), **const_kw),                    # b2
    ]
    out_spec = pl.BlockSpec((bm, o_pad), lambda i: (i, 0))

    weight_bytes = sum(int(params[k].size) * jnp.dtype(params[k].dtype).itemsize
                       for k in ("gamma", "beta", "w1", "b1", "w2", "b2"))
    cost = pl.CostEstimate(
        flops=2 * n * (in_dim * h_pad + h_pad * o_pad),
        transcendentals=n * h_pad,
        bytes_accessed=int(x2.size) * x_isz + weight_bytes + n * o_pad * x_isz,
    )

    kernel = functools.partial(_ffn_kernel, gelu_dtype=gelu_dtype)
    out = pl.pallas_call(
        kernel,
        out_shape=jax.ShapeDtypeStruct((n, o_pad), x.dtype),
        grid_spec=pltpu.PrefetchScalarGridSpec(
            num_scalar_prefetch=0,
            grid=grid,
            in_specs=in_specs,
            out_specs=out_spec,
        ),
        compiler_params=pltpu.CompilerParams(
            dimension_semantics=("parallel",),
            vmem_limit_bytes=hw["vmem_limit"],
        ),
        cost_estimate=cost,
    )(x2, params["gamma"], params["beta"], params["w1"], params["b1"],
      params["w2"], params["b2"])

    if o_pad != out_dim:
        out = out[:, :out_dim]
    return out.reshape(*orig_shape[:-1], out_dim)


def _reference(x, gamma, beta, w1, b1, w2, b2):
    x = x.astype(jnp.float32)
    mu = jnp.mean(x, axis=-1, keepdims=True)
    var = jnp.mean((x - mu) ** 2, axis=-1, keepdims=True)
    xn = (x - mu) / jnp.sqrt(var + 1e-6) * gamma + beta
    h = xn @ w1 + b1
    h = 0.5 * h * (1.0 + jnp.tanh(_GELU_C * (h + 0.044715 * h ** 3)))
    return h @ w2 + b2


if __name__ == "__main__":
    key = jax.random.PRNGKey(0)
    B, S, in_dim, out_dim = 2, 8, 32, 32
    hidden = in_dim * 2

    k = jax.random.split(key, 8)
    x = jax.random.normal(k[0], (B, S, in_dim), dtype=jnp.float32)

    # deterministic synthetic parameters (PyTorch-ish uniform fan-in init)
    gamma = 1.0 + 0.05 * jax.random.normal(k[1], (in_dim,), jnp.float32)
    beta = 0.05 * jax.random.normal(k[2], (in_dim,), jnp.float32)
    lim1 = 1.0 / math.sqrt(in_dim)
    w1 = jax.random.uniform(k[3], (in_dim, hidden), jnp.float32, -lim1, lim1)
    b1 = jax.random.uniform(k[4], (hidden,), jnp.float32, -lim1, lim1)
    lim2 = 1.0 / math.sqrt(hidden)
    w2 = jax.random.uniform(k[5], (hidden, out_dim), jnp.float32, -lim2, lim2)
    b2 = jax.random.uniform(k[6], (out_dim,), jnp.float32, -lim2, lim2)

    ref = _reference(x, gamma, beta, w1, b1, w2, b2)

    # 1) f32 MXU path (tight tolerance).
    p_f32 = prepare_ffn_params(gamma, beta, w1, b1, w2, b2, matmul_dtype=jnp.float32)
    out_f32 = jax.block_until_ready(feed_forward(x, p_f32))
    assert out_f32.shape == (B, S, out_dim), out_f32.shape
    assert jnp.allclose(out_f32, ref, atol=1e-4, rtol=1e-4), float(
        jnp.max(jnp.abs(out_f32 - ref)))

    # 2) default bf16 MXU path (looser tolerance).
    p_bf16 = prepare_ffn_params(gamma, beta, w1, b1, w2, b2)
    out_bf16 = jax.block_until_ready(feed_forward(x, p_bf16))
    assert jnp.allclose(out_bf16, ref, atol=5e-2, rtol=5e-2), float(
        jnp.max(jnp.abs(out_bf16 - ref)))

    # 3) ragged token count (13 rows, block_m=8 -> partial last tile, no token padding).
    x_ragged = x.reshape(-1, in_dim)[:13]
    ref_ragged = _reference(x_ragged, gamma, beta, w1, b1, w2, b2)
    out_ragged = jax.block_until_ready(feed_forward(x_ragged, p_f32, block_m=8))
    assert out_ragged.shape == (13, out_dim), out_ragged.shape
    assert jnp.allclose(out_ragged, ref_ragged, atol=1e-4, rtol=1e-4), float(
        jnp.max(jnp.abs(out_ragged - ref_ragged)))

    # 4) multi-chunk hidden dimension (exercises the fori_loop accumulation path).
    in2, out2 = 128, 64
    hid2 = 2 * in2
    kk = jax.random.split(k[7], 6)
    x4 = jax.random.normal(kk[0], (B, S, in2), dtype=jnp.float32)
    g4 = 1.0 + 0.05 * jax.random.normal(kk[1], (in2,), jnp.float32)
    be4 = 0.05 * jax.random.normal(kk[2], (in2,), jnp.float32)
    l1 = 1.0 / math.sqrt(in2)
    w14 = jax.random.uniform(kk[3], (in2, hid2), jnp.float32, -l1, l1)
    b14 = jax.random.uniform(kk[4], (hid2,), jnp.float32, -l1, l1)
    l2 = 1.0 / math.sqrt(hid2)
    w24 = jax.random.uniform(kk[5], (hid2, out2), jnp.float32, -l2, l2)
    b24 = jnp.zeros((out2,), jnp.float32)
    p4 = prepare_ffn_params(g4, be4, w14, b14, w24, b24,
                            matmul_dtype=jnp.float32, hidden_chunk=128)
    assert p4["n_chunks"] == 2
    out4 = jax.block_until_ready(feed_forward(x4, p4))
    ref4 = _reference(x4, g4, be4, w14, b14, w24, b24)
    assert out4.shape == (B, S, out2), out4.shape
    assert jnp.allclose(out4, ref4, atol=1e-3, rtol=1e-3), float(
        jnp.max(jnp.abs(out4 - ref4)))

    print("KERNEL_OK")
</pallas_src>

<mosaic_0001>
module attributes {stable_mosaic.version = 11 : i64} {
  func.func @_copy(%arg0: i32, %arg1: memref<8x128xf32, #tpu.memory_space<vmem>>, %arg2: memref<8x128xf32, #tpu.memory_space<vmem>>) attributes {dimension_semantics = [#tpu.dimension_semantics<arbitrary>], iteration_bounds = array<i64: 1>, scalar_prefetch = 0 : i64, scratch_operands = 0 : i64, tpu.core_type = #tpu.core_type<tc>, window_params = [{pipeline_mode = #tpu.pipeline_mode<synchronous>, transform_indices = @transform_0, window_bounds = array<i64: 8, 128>}, {pipeline_mode = #tpu.pipeline_mode<synchronous>, transform_indices = @transform_1, window_bounds = array<i64: 8, 128>}]} {
    %c0 = arith.constant 0 : index
    %c0_0 = arith.constant 0 : index
    %0 = vector.load %arg1[%c0, %c0_0] : memref<8x128xf32, #tpu.memory_space<vmem>>, vector<8x128xf32>
    %c0_1 = arith.constant 0 : index
    %c0_2 = arith.constant 0 : index
    %1 = vector.load %arg2[%c0_1, %c0_2] : memref<8x128xf32, #tpu.memory_space<vmem>>, vector<8x128xf32>
    tpu.vector_store %arg2[%c0_1, %c0_2], %0 {strides = array<i32>} : memref<8x128xf32, #tpu.memory_space<vmem>>, vector<8x128xf32>,
    return
  }
  func.func @transform_0(%arg0: i32) -> (i32, i32) {
    %c0_i32 = arith.constant 0 : i32
    %c0_i32_0 = arith.constant 0 : i32
    %c0_i32_1 = arith.constant 0 : i32
    return %c0_i32, %c0_i32_0 : i32, i32
  }
  func.func @transform_1(%arg0: i32) -> (i32, i32) {
    %c0_i32 = arith.constant 0 : i32
    %c0_i32_0 = arith.constant 0 : i32
    %c0_i32_1 = arith.constant 0 : i32
    return %c0_i32, %c0_i32_0 : i32, i32
  }
}

module attributes {stable_mosaic.version = 11 : i64} {
  func.func @_ffn_kernel(%arg0: i32, %arg1: memref<16x32xf32, #tpu.memory_space<vmem>>, %arg2: memref<1x32xf32, #tpu.memory_space<vmem>>, %arg3: memref<1x32xf32, #tpu.memory_space<vmem>>, %arg4: memref<1x32x128xf32, #tpu.memory_space<vmem>>, %arg5: memref<1x1x128xf32, #tpu.memory_space<vmem>>, %arg6: memref<1x128x128xf32, #tpu.memory_space<vmem>>, %arg7: memref<1x128xf32, #tpu.memory_space<vmem>>, %arg8: memref<16x128xf32, #tpu.memory_space<vmem>>) attributes {dimension_semantics = [#tpu.dimension_semantics<parallel>], iteration_bounds = array<i64: 1>, scalar_prefetch = 0 : i64, scratch_operands = 0 : i64, tpu.core_type = #tpu.core_type<tc>, window_params = [{transform_indices = @transform_0, window_bounds = array<i64: 16, 32>}, {pipeline_mode = #tpu.pipeline_mode<synchronous>, transform_indices = @transform_1, window_bounds = array<i64: 1, 32>}, {pipeline_mode = #tpu.pipeline_mode<synchronous>, transform_indices = @transform_2, window_bounds = array<i64: 1, 32>}, {pipeline_mode = #tpu.pipeline_mode<synchronous>, transform_indices = @transform_3, window_bounds = array<i64: 1, 32, 128>}, {pipeline_mode = #tpu.pipeline_mode<synchronous>, transform_indices = @transform_4, window_bounds = array<i64: 1, 1, 128>}, {pipeline_mode = #tpu.pipeline_mode<synchronous>, transform_indices = @transform_5, window_bounds = array<i64: 1, 128, 128>}, {pipeline_mode = #tpu.pipeline_mode<synchronous>, transform_indices = @transform_6, window_bounds = array<i64: 1, 128>}, {transform_indices = @transform_7, window_bounds = array<i64: 16, 128>}]} {
    %c0 = arith.constant 0 : index
    %c0_0 = arith.constant 0 : index
    %0 = vector.load %arg1[%c0, %c0_0] : memref<16x32xf32, #tpu.memory_space<vmem>>, vector<16x32xf32>
    %cst = arith.constant dense<0.000000e+00> : vector<16xf32>
    %1 = vector.multi_reduction <add>, %0, %cst [1] : vector<16x32xf32> to vector<16xf32>
    %2 = vector.shape_cast %1 : vector<16xf32> to vector<16x1xf32>
    %cst_1 = arith.constant 3.200000e+01 : f32
    %3 = vector.broadcast %cst_1 : f32 to vector<16x1xf32>
    %4 = arith.divf %2, %3 : vector<16x1xf32>
    %5 = vector.broadcast %4 : vector<16x1xf32> to vector<16x32xf32>
    %6 = arith.subf %0, %5 : vector<16x32xf32>
    %7 = arith.mulf %6, %6 : vector<16x32xf32>
    %cst_2 = arith.constant dense<0.000000e+00> : vector<16xf32>
    %8 = vector.multi_reduction <add>, %7, %cst_2 [1] : vector<16x32xf32> to vector<16xf32>
    %9 = vector.shape_cast %8 : vector<16xf32> to vector<16x1xf32>
    %cst_3 = arith.constant 3.200000e+01 : f32
    %10 = vector.broadcast %cst_3 : f32 to vector<16x1xf32>
    %11 = arith.divf %9, %10 : vector<16x1xf32>
    %cst_4 = arith.constant 9.99999997E-7 : f32
    %12 = vector.broadcast %cst_4 : f32 to vector<16x1xf32>
    %13 = arith.addf %11, %12 : vector<16x1xf32>
    %14 = math.rsqrt %13 : vector<16x1xf32>
    %15 = vector.broadcast %14 : vector<16x1xf32> to vector<16x32xf32>
    %16 = arith.mulf %6, %15 : vector<16x32xf32>
    %c0_5 = arith.constant 0 : index
    %c0_6 = arith.constant 0 : index
    %17 = vector.load %arg2[%c0_5, %c0_6] : memref<1x32xf32, #tpu.memory_space<vmem>>, vector<1x32xf32>
    %18 = vector.broadcast %17 : vector<1x32xf32> to vector<16x32xf32>
    %19 = arith.mulf %16, %18 : vector<16x32xf32>
    %c0_7 = arith.constant 0 : index
    %c0_8 = arith.constant 0 : index
    %20 = vector.load %arg3[%c0_7, %c0_8] : memref<1x32xf32, #tpu.memory_space<vmem>>, vector<1x32xf32>
    %21 = vector.broadcast %20 : vector<1x32xf32> to vector<16x32xf32>
    %22 = arith.addf %19, %21 : vector<16x32xf32>
    %cst_9 = arith.constant 0.000000e+00 : f32
    %23 = vector.broadcast %cst_9 : f32 to vector<16x128xf32>
    %c0_10 = arith.constant 0 : index
    %c0_11 = arith.constant 0 : index
    %c0_12 = arith.constant 0 : index
    %24 = vector.load %arg4[%c0_10, %c0_11, %c0_12] : memref<1x32x128xf32, #tpu.memory_space<vmem>>, vector<1x32x128xf32>
    %25 = vector.shape_cast %24 : vector<1x32x128xf32> to vector<32x128xf32>
    %c0_13 = arith.constant 0 : index
    %c0_14 = arith.constant 0 : index
    %c0_15 = arith.constant 0 : index
    %26 = vector.load %arg5[%c0_13, %c0_14, %c0_15] : memref<1x1x128xf32, #tpu.memory_space<vmem>>, vector<1x1x128xf32>
    %27 = vector.shape_cast %26 : vector<1x1x128xf32> to vector<1x128xf32>
    %c0_16 = arith.constant 0 : index
    %c0_17 = arith.constant 0 : index
    %c0_18 = arith.constant 0 : index
    %28 = vector.load %arg6[%c0_16, %c0_17, %c0_18] : memref<1x128x128xf32, #tpu.memory_space<vmem>>, vector<1x128x128xf32>
    %29 = vector.shape_cast %28 : vector<1x128x128xf32> to vector<128x128xf32>
    %cst_19 = arith.constant dense<0.000000e+00> : vector<16x128xf32>
    %30 = tpu.matmul %22, %25, %cst_19 {dimension_numbers = #tpu.dot_dimension_numbers<[1], [0], [0], [1], [0, 0, 1, 1], [], []>} : vector<16x32xf32>, vector<32x128xf32>, vector<16x128xf32> -> vector<16x128xf32>
    %31 = vector.broadcast %27 : vector<1x128xf32> to vector<16x128xf32>
    %32 = arith.addf %30, %31 : vector<16x128xf32>
    %cst_20 = arith.constant 5.000000e-01 : f32
    %33 = vector.broadcast %cst_20 : f32 to vector<16x128xf32>
    %34 = arith.mulf %33, %32 : vector<16x128xf32>
    %cst_21 = arith.constant 4.471500e-02 : f32
    %35 = vector.broadcast %cst_21 : f32 to vector<16x128xf32>
    %36 = arith.mulf %35, %32 : vector<16x128xf32>
    %37 = arith.mulf %36, %32 : vector<16x128xf32>
    %38 = arith.mulf %37, %32 : vector<16x128xf32>
    %39 = arith.addf %32, %38 : vector<16x128xf32>
    %cst_22 = arith.constant 0.797884583 : f32
    %40 = vector.broadcast %cst_22 : f32 to vector<16x128xf32>
    %41 = arith.mulf %40, %39 : vector<16x128xf32>
    %42 = math.tanh %41 : vector<16x128xf32>
    %cst_23 = arith.constant 1.000000e+00 : f32
    %43 = vector.broadcast %cst_23 : f32 to vector<16x128xf32>
    %44 = arith.addf %43, %42 : vector<16x128xf32>
    %45 = arith.mulf %34, %44 : vector<16x128xf32>
    %cst_24 = arith.constant dense<0.000000e+00> : vector<16x128xf32>
    %46 = tpu.matmul %45, %29, %cst_24 {dimension_numbers = #tpu.dot_dimension_numbers<[1], [0], [0], [1], [0, 0, 1, 1], [], []>} : vector<16x128xf32>, vector<128x128xf32>, vector<16x128xf32> -> vector<16x128xf32>
    %47 = arith.addf %23, %46 : vector<16x128xf32>
    %c0_25 = arith.constant 0 : index
    %c0_26 = arith.constant 0 : index
    %48 = vector.load %arg7[%c0_25, %c0_26] : memref<1x128xf32, #tpu.memory_space<vmem>>, vector<1x128xf32>
    %49 = vector.broadcast %48 : vector<1x128xf32> to vector<16x128xf32>
    %50 = arith.addf %47, %49 : vector<16x128xf32>
    %c0_27 = arith.constant 0 : index
    %c0_28 = arith.constant 0 : index
    %51 = vector.load %arg8[%c0_27, %c0_28] : memref<16x128xf32, #tpu.memory_space<vmem>>, vector<16x128xf32>
    tpu.vector_store %arg8[%c0_27, %c0_28], %50 {strides = array<i32>} : memref<16x128xf32, #tpu.memory_space<vmem>>, vector<16x128xf32>,
    return
  }
  func.func @transform_0(%arg0: i32) -> (i32, i32) {
    %c0_i32 = arith.constant 0 : i32
    %c0_i32_0 = arith.constant 0 : i32
    return %arg0, %c0_i32 : i32, i32
  }
  func.func @transform_1(%arg0: i32) -> (i32, i32) {
    %c0_i32 = arith.constant 0 : i32
    %c0_i32_0 = arith.constant 0 : i32
    %c0_i32_1 = arith.constant 0 : i32
    return %c0_i32, %c0_i32_0 : i32, i32
  }
  func.func @transform_2(%arg0: i32) -> (i32, i32) {
    %c0_i32 = arith.constant 0 : i32
    %c0_i32_0 = arith.constant 0 : i32
    %c0_i32_1 = arith.constant 0 : i32
    return %c0_i32, %c0_i32_0 : i32, i32
  }
  func.func @transform_3(%arg0: i32) -> (i32, i32, i32) {
    %c0_i32 = arith.constant 0 : i32
    %c0_i32_0 = arith.constant 0 : i32
    %c0_i32_1 = arith.constant 0 : i32
    %c0_i32_2 = arith.constant 0 : i32
    return %c0_i32, %c0_i32_0, %c0_i32_1 : i32, i32, i32
  }
  func.func @transform_4(%arg0: i32) -> (i32, i32, i32) {
    %c0_i32 = arith.constant 0 : i32
    %c0_i32_0 = arith.constant 0 : i32
    %c0_i32_1 = arith.constant 0 : i32
    %c0_i32_2 = arith.constant 0 : i32
    return %c0_i32, %c0_i32_0, %c0_i32_1 : i32, i32, i32
  }
  func.func @transform_5(%arg0: i32) -> (i32, i32, i32) {
    %c0_i32 = arith.constant 0 : i32
    %c0_i32_0 = arith.constant 0 : i32
    %c0_i32_1 = arith.constant 0 : i32
    %c0_i32_2 = arith.constant 0 : i32
    return %c0_i32, %c0_i32_0, %c0_i32_1 : i32, i32, i32
  }
  func.func @transform_6(%arg0: i32) -> (i32, i32) {
    %c0_i32 = arith.constant 0 : i32
    %c0_i32_0 = arith.constant 0 : i32
    %c0_i32_1 = arith.constant 0 : i32
    return %c0_i32, %c0_i32_0 : i32, i32
  }
  func.func @transform_7(%arg0: i32) -> (i32, i32) {
    %c0_i32 = arith.constant 0 : i32
    %c0_i32_0 = arith.constant 0 : i32
    return %arg0, %c0_i32 : i32, i32
  }
}

</mosaic_0001>

<bundles_post_ra>
// kernel: tpu_custom_call.1
= control target key start
LH: loop header
LB: loop body
LE: loop exit
PB: predicated region body
PF: predicated region fallthrough
CT: control target
= control target key end

     0   :  { %6 = vsyncpa [#allocation3], 0  ;;  %s124_s0 = inlined_call_operand.hbm [shape: f32[8,128], index: 0, kind: input, shape index: {}]   ;;  %s125_s1 = inlined_call_operand.hbm [shape: f32[8,128], index: 1, kind: output, shape index: {}]  }
   0x1   :  { %7 = vsyncpa [#allocation4], 0  ;;  %s88_s6 = smov [#allocation2]   ;;  %s40_s10 = scalar_lea.hbm %s124_s0, 128 }
   0x2   :  { %s14_s7 = sshll.u32 %s88_s6, 4  ;;  %p41_p0 = scmp.ne.s32.totalorder %s124_s0, %s40_s10  ;;  %s15_s7 = int_to_ptr.vmem [resolvable:$true] %s14_s7 }
   0x3   :  { %p44_p1 = scmp.lt.u32.totalorder %s40_s10, %s124_s0 }
   0x5   :  { %p46_p2 = pnand %p44_p1, %p41_p0 }
   0x7   :  { %49 = shalt.err (!%p46_p2)
}
   0x8   :  { %s50_s15 = scalar_lea.vmem %s15_s7, 128  ;;  %p55_p4 = scmp.lt.s32.totalorder %s15_s7, %s15_s7 }
   0x9   :  { %p51_p3 = scmp.ne.s32.totalorder %s15_s7, %s50_s15  ;;  %p56_p5 = scmp.lt.s32.totalorder %s50_s15, %s50_s15 }
   0xb   :  { %p57_p6 = por %p56_p5, %p55_p4 }
   0xd   :  { %p58_p7 = pnand %p57_p6, %p51_p3 }
   0xf   :  { %61 = shalt.err (!%p58_p7)
}
  0x10   :  { %17 = dma.hbm_to_vmem [thread:$0]  %s124_s0, 128, %s15_s7, [#allocation3]  }
  0x11   :  { %84 = dma.done.wait [#allocation3], 128  }
  0x12   :  { %85 = vsyncadd [#allocation3], 4294967168  ;;  %s89_s18 = smov [#allocation5]   ;;  %v21_v0 = vld [vmem:[#allocation2] sm:$0xff] }
  0x13   :  { %s29_s19 = sshll.u32 %s89_s18, 4  ;;  %22 = vst [vmem:[#allocation5] sm:$0xff] %v21_v0  ;;  %s30_s19 = int_to_ptr.vmem [resolvable:$true] %s29_s19 }
  0x14   :  { %s62_s20 = scalar_lea.vmem %s30_s19, 128  ;;  %p67_p9 = scmp.lt.s32.totalorder %s30_s19, %s30_s19 }
  0x15   :  { %p63_p8 = scmp.ne.s32.totalorder %s30_s19, %s62_s20  ;;  %p68_p10 = scmp.lt.s32.totalorder %s62_s20, %s62_s20 }
  0x17   :  { %p69_p11 = por %p68_p10, %p67_p9 }
  0x19   :  { %p70_p12 = pnand %p69_p11, %p63_p8 }
  0x1b   :  { %73 = shalt.err (!%p70_p12)
}
  0x1c   :  { %s74_s23 = scalar_lea.hbm %s125_s1, 128 }
  0x1d   :  { %p75_p13 = scmp.ne.s32.totalorder %s125_s1, %s74_s23  ;;  %p78_p0 = scmp.lt.u32.totalorder %s74_s23, %s125_s1 }
  0x1f   :  { %p80_p1 = pnand %p78_p0, %p75_p13 }
  0x21   :  { %83 = shalt.err (!%p80_p1)
}
  0x22   :  { %32 = dma.vmem_to_hbm [thread:$0]  %s30_s19, 128, %s125_s1, [#allocation4]  }
  0x23   :  { %86 = dma.done.wait [#allocation4], 128  }
  0x24   :  { %87 = vsyncadd [#allocation4], 4294967168 }
  0x25   :  { %36 = vsyncpa [#allocation3], 1 }
  0x26   :  { %37 = vsyncpa [#allocation4], 1 }

// kernel: tpu_custom_call.1
= control target key start
LH: loop header
LB: loop body
LE: loop exit
PB: predicated region body
PF: predicated region fallthrough
CT: control target
= control target key end

     0   :  { %12 = vsyncpa [#allocation3], 0  ;;  %s876_s0 = inlined_call_operand.hbm [shape: f32[16,32], index: 0, kind: input, shape index: {}]   ;;  %s877_s1 = inlined_call_operand.hbm [shape: f32[1,32], index: 1, kind: input, shape index: {}]   ;;  %s878_s2 = inlined_call_operand.hbm [shape: f32[1,32], index: 2, kind: input, shape index: {}]   ;;  %s879_s3 = inlined_call_operand.hbm [shape: f32[1,32,128], index: 3, kind: input, shape index: {}]   ;;  %s880_s4 = inlined_call_operand.hbm [shape: f32[1,1,128], index: 4, kind: input, shape index: {}]   ;;  %s881_s5 = inlined_call_operand.hbm [shape: f32[1,128,128], index: 5, kind: input, shape index: {}]   ;;  %s882_s6 = inlined_call_operand.hbm [shape: f32[1,128], index: 6, kind: input, shape index: {}]   ;;  %s883_s7 = inlined_call_operand.hbm [shape: f32[16,128], index: 7, kind: output, shape index: {}]  }
   0x1   :  { %13 = vsyncpa [#allocation6], 0 }
   0x2   :  { %14 = vsyncpa [#allocation9], 0 }
   0x3   :  { %15 = vsyncpa [#allocation12], 0 }
   0x4   :  { %16 = vsyncpa [#allocation4], 0  ;;  %s712_s24 = smov [#allocation5]   ;;  %s526_s28 = scalar_lea.hbm %s877_s1, 16 }
   0x5   :  { %s35_s25 = sshll.u32 %s712_s24, 4  ;;  %p527_p0 = scmp.ne.s32.totalorder %s877_s1, %s526_s28  ;;  %s36_s25 = int_to_ptr.vmem [resolvable:$true] %s35_s25 }
   0x6   :  { %p530_p1 = scmp.lt.u32.totalorder %s526_s28, %s877_s1 }
   0x8   :  { %p532_p2 = pnand %p530_p1, %p527_p0 }
   0xa   :  { %535 = shalt.err (!%p532_p2)
}
   0xb   :  { %s536_s10 = scalar_lea.vmem %s36_s25, 16  ;;  %s540_s11 = scalar_lea.vmem %s36_s25, 32 }
   0xc   :  { %p537_p3 = scmp.ne.s32.totalorder %s36_s25, %s536_s10  ;;  %p541_p4 = scmp.lt.s32.totalorder %s36_s25, %s36_s25 }
   0xd   :  { %p542_p5 = scmp.lt.s32.totalorder %s540_s11, %s536_s10 }
   0xf   :  { %p543_p6 = por %p542_p5, %p541_p4 }
  0x11   :  { %p544_p7 = pnand %p543_p6, %p537_p3 }
  0x13   :  { %547 = shalt.err (!%p544_p7)
}
  0x14   :  { %38 = dma.hbm_to_vmem [thread:$0]  %s877_s1, 16, %s36_s25, [#allocation6]  }
  0x15   :  { %s713_s14 = smov [#allocation8]   ;;  %s714_s16 = smov [#allocation11]  }
  0x16   :  { %s54_s15 = sshll.u32 %s713_s14, 4  ;;  %s76_s17 = sshll.u32 %s714_s16, 4  ;;  %s55_s15 = int_to_ptr.vmem [resolvable:$true] %s54_s15  ;;  %s77_s17 = int_to_ptr.vmem [resolvable:$true] %s76_s17 }
  0x17   :  { %s548_s20 = scalar_lea.hbm %s879_s3, 512 }
  0x18   :  { %p549_p8 = scmp.ne.s32.totalorder %s879_s3, %s548_s20  ;;  %p552_p9 = scmp.lt.u32.totalorder %s548_s20, %s879_s3 }
  0x1a   :  { %p554_p10 = pnand %p552_p9, %p549_p8 }
  0x1c   :  { %557 = shalt.err (!%p554_p10)
}
  0x1d   :  { %s558_s1 = scalar_lea.vmem %s55_s15, 512  ;;  %p563_p12 = scmp.lt.s32.totalorder %s55_s15, %s55_s15 }
  0x1e   :  { %p559_p11 = scmp.ne.s32.totalorder %s55_s15, %s558_s1  ;;  %p564_p13 = scmp.lt.s32.totalorder %s558_s1, %s558_s1 }
  0x20   :  { %p565_p0 = por %p564_p13, %p563_p12 }
  0x22   :  { %p566_p1 = pnand %p565_p0, %p559_p11 }
  0x24   :  { %569 = shalt.err (!%p566_p1)
}
  0x25   :  { %s715_s25 = smov 128   ;;  %s716_s26 = smov 8  }
  0x26   :  { %60 = dma.hbm_to_vmem [thread:$0]  %s879_s3, 512, %s55_s15, [#allocation9], %s715_s25, %s715_s25, %s716_s26  }
  0x27   :  { %s570_s8 = scalar_lea.hbm %s881_s5, 2048 }
  0x28   :  { %p571_p2 = scmp.ne.s32.totalorder %s881_s5, %s570_s8  ;;  %p574_p3 = scmp.lt.u32.totalorder %s570_s8, %s881_s5 }
  0x2a   :  { %p576_p4 = pnand %p574_p3, %p571_p2 }
  0x2c   :  { %579 = shalt.err (!%p576_p4)
}
  0x2d   :  { %s580_s13 = scalar_lea.vmem %s77_s17, 2048  ;;  %p585_p6 = scmp.lt.s32.totalorder %s77_s17, %s77_s17 }
  0x2e   :  { %p581_p5 = scmp.ne.s32.totalorder %s77_s17, %s580_s13  ;;  %p586_p7 = scmp.lt.s32.totalorder %s580_s13, %s580_s13 }
  0x30   :  { %p587_p8 = por %p586_p7, %p585_p6 }
  0x32   :  { %p588_p9 = pnand %p587_p8, %p581_p5 }
  0x34   :  { %591 = shalt.err (!%p588_p9)
}
  0x35   :  { %82 = dma.hbm_to_vmem [thread:$0]  %s881_s5, 2048, %s77_s17, [#allocation12], %s715_s25, %s715_s25, %s716_s26  }
  0x36   :  { %s717_s15 = smov [#allocation2]   ;;  %s718_s18 = smov [#allocation7]  }
  0x37   :  { %s22_s16 = sshll.u32 %s717_s15, 4  ;;  %s45_s19 = sshll.u32 %s718_s18, 4  ;;  %s23_s16 = int_to_ptr.vmem [resolvable:$true] %s22_s16  ;;  %s46_s19 = int_to_ptr.vmem [resolvable:$true] %s45_s19 }
  0x38   :  { %s592_s22 = scalar_lea.hbm %s876_s0, 256 }
  0x39   :  { %p593_p10 = scmp.ne.s32.totalorder %s876_s0, %s592_s22  ;;  %p596_p11 = scmp.lt.u32.totalorder %s592_s22, %s876_s0 }
  0x3b   :  { %p598_p12 = pnand %p596_p11, %p593_p10 }
  0x3d   :  { %601 = shalt.err (!%p598_p12)
}
  0x3e   :  { %s602_s5 = scalar_lea.vmem %s23_s16, 256  ;;  %p607_p0 = scmp.lt.s32.totalorder %s23_s16, %s23_s16 }
  0x3f   :  { %p603_p13 = scmp.ne.s32.totalorder %s23_s16, %s602_s5  ;;  %p608_p1 = scmp.lt.s32.totalorder %s602_s5, %s602_s5 }
  0x41   :  { %p609_p2 = por %p608_p1, %p607_p0 }
  0x43   :  { %p610_p3 = pnand %p609_p2, %p603_p13 }
  0x45   :  { %613 = shalt.err (!%p610_p3)
}
  0x46   :  { %28 = dma.hbm_to_vmem [thread:$0]  %s876_s0, 256, %s23_s16, [#allocation3], %s715_s25, %s715_s25, %s716_s26  }
  0x47   :  { %s614_s8 = scalar_lea.hbm %s878_s2, 16 }
  0x48   :  { %p615_p4 = scmp.ne.s32.totalorder %s878_s2, %s614_s8  ;;  %p618_p5 = scmp.lt.u32.totalorder %s614_s8, %s878_s2 }
  0x4a   :  { %p620_p6 = pnand %p618_p5, %p615_p4 }
  0x4c   :  { %623 = shalt.err (!%p620_p6)
}
  0x4d   :  { %s624_s13 = scalar_lea.vmem %s46_s19, 16  ;;  %s628_s3 = scalar_lea.vmem %s46_s19, 32 }
  0x4e   :  { %p625_p7 = scmp.ne.s32.totalorder %s46_s19, %s624_s13  ;;  %p629_p8 = scmp.lt.s32.totalorder %s46_s19, %s46_s19 }
  0x4f   :  { %p630_p9 = scmp.lt.s32.totalorder %s628_s3, %s624_s13 }
  0x51   :  { %p631_p10 = por %p630_p9, %p629_p8 }
  0x53   :  { %p632_p11 = pnand %p631_p10, %p625_p7 }
  0x55   :  { %635 = shalt.err (!%p632_p11)
}
  0x56   :  { %48 = dma.hbm_to_vmem [thread:$0]  %s878_s2, 16, %s46_s19, [#allocation6]  }
  0x57   :  { %s719_s15 = smov [#allocation10]   ;;  %s720_s18 = smov [#allocation13]  }
  0x58   :  { %s67_s16 = sshll.u32 %s719_s15, 4  ;;  %s89_s20 = sshll.u32 %s720_s18, 4  ;;  %s68_s16 = int_to_ptr.vmem [resolvable:$true] %s67_s16  ;;  %s90_s20 = int_to_ptr.vmem [resolvable:$true] %s89_s20 }
  0x59   :  { %s636_s23 = scalar_lea.hbm %s880_s4, 16 }
  0x5a   :  { %p637_p12 = scmp.ne.s32.totalorder %s880_s4, %s636_s23  ;;  %p640_p13 = scmp.lt.u32.totalorder %s636_s23, %s880_s4 }
  0x5c   :  { %p642_p0 = pnand %p640_p13, %p637_p12 }
  0x5e   :  { %645 = shalt.err (!%p642_p0)
}
  0x5f   :  { %s646_s2 = scalar_lea.vmem %s68_s16, 16  ;;  %s650_s19 = scalar_lea.vmem %s68_s16, 32 }
  0x60   :  { %p647_p1 = scmp.ne.s32.totalorder %s68_s16, %s646_s2  ;;  %p651_p2 = scmp.lt.s32.totalorder %s68_s16, %s68_s16 }
  0x61   :  { %p652_p3 = scmp.lt.s32.totalorder %s650_s19, %s646_s2 }
  0x63   :  { %p653_p4 = por %p652_p3, %p651_p2 }
  0x65   :  { %p654_p5 = pnand %p653_p4, %p647_p1 }
  0x67   :  { %657 = shalt.err (!%p654_p5)
}
  0x68   :  { %70 = dma.hbm_to_vmem [thread:$0]  %s880_s4, 16, %s68_s16, [#allocation9]  }
  0x69   :  { %s658_s8 = scalar_lea.hbm %s882_s6, 16 }
  0x6a   :  { %p659_p6 = scmp.ne.s32.totalorder %s882_s6, %s658_s8  ;;  %p662_p7 = scmp.lt.u32.totalorder %s658_s8, %s882_s6 }
  0x6c   :  { %p664_p8 = pnand %p662_p7, %p659_p6 }
  0x6e   :  { %667 = shalt.err (!%p664_p8)
}
  0x6f   :  { %s668_s13 = scalar_lea.vmem %s90_s20, 16  ;;  %s672_s3 = scalar_lea.vmem %s90_s20, 32 }
  0x70   :  { %p669_p9 = scmp.ne.s32.totalorder %s90_s20, %s668_s13  ;;  %p673_p10 = scmp.lt.s32.totalorder %s90_s20, %s90_s20 }
  0x71   :  { %p674_p11 = scmp.lt.s32.totalorder %s672_s3, %s668_s13 }
  0x73   :  { %p675_p12 = por %p674_p11, %p673_p10 }
  0x75   :  { %p676_p13 = pnand %p675_p12, %p669_p9 }
  0x77   :  { %679 = shalt.err (!%p676_p13)
}
  0x78   :  { %92 = dma.hbm_to_vmem [thread:$0]  %s882_s6, 16, %s90_s20, [#allocation12]  }
  0x79   :  { %702 = dma.done.wait [#allocation3], 256  }
  0x7a   :  { %703 = vsyncadd [#allocation3], 4294967040 }
  0x7b   :  { %704 = dma.done.wait [#allocation6], 32  }
  0x7c   :  { %705 = vsyncadd [#allocation6], 4294967264 }
  0x7d   :  { %706 = dma.done.wait [#allocation9], 528  }
  0x7e   :  { %707 = vsyncadd [#allocation9], 4294966768 }
  0x7f   :  { %708 = dma.done.wait [#allocation12], 2064  }
  0x80   :  { %709 = vsyncadd [#allocation12], 4294965232  ;;  %vm116_vm0 = vcmask 261120   ;;  %v114_v0 = vld [vmem:[#allocation2] sm:$0xff]  ;;  %v115_v1 = vld [vmem:[#allocation2 + $0x8] sm:$0xff]  ;;  %s721_s6 = smov [#allocation14]  }
  0x81   :  { %v117_v2 = vsel %vm116_vm0, %v114_v0, 0.0  ;;  %v120_v3 = vsel %vm116_vm0, %v115_v1, 0.0  ;;  %v162_v14 = vld [vmem:[#allocation8] sm:$0xff]  ;;  %v163_v15 = vld [vmem:[#allocation8 + $0x8] sm:$0xff]  ;;  %v164_v16 = vld [vmem:[#allocation8 + $0x10] sm:$0xff]  ;;  %s377_s14 = sshll.u32 %s721_s6, 4  ;;  %s378_s14 = int_to_ptr.vmem [resolvable:$true] %s377_s14 }
  0x82   :  { %118 = vadd.xlane.f32.xlu0 %v117_v2  ;;  %v468_v17 = vpack.c.bf16 %v163_v15, %v162_v14  ;;  %v165_v18 = vld [vmem:[#allocation8 + $0x18] sm:$0xff]  ;;  %v167_v20 = vld [vmem:[#allocation11] sm:$0xff]  ;;  %v168_v21 = vld [vmem:[#allocation11 + $0x8] sm:$0xff]  ;;  %s680_s15 = scalar_lea.vmem %s378_s14, 256  ;;  %p685_p1 = scmp.lt.s32.totalorder %s378_s14, %s378_s14 }
  0x83   :  { %v472_v19 = vpack.c.bf16 %v165_v18, %v164_v16  ;;  %v476_v22 = vpack.c.bf16 %v168_v21, %v167_v20  ;;  %v392_v30 = vld [vmem:[#allocation5] ss:$0 sm:$0xff]  ;;  %v393_v32 = vld [vmem:[#allocation7] ss:$0 sm:$0xff]  ;;  %v169_v39 = vld [vmem:[#allocation11 + $0x10] sm:$0xff]  ;;  %p681_p0 = scmp.ne.s32.totalorder %s378_s14, %s680_s15  ;;  %p686_p2 = scmp.lt.s32.totalorder %s680_s15, %s680_s15 }
  0x84   :  { %469 = vmatprep.subr.bf16.mxu0 %v468_v17  ;;  %v170_v40 = vld [vmem:[#allocation11 + $0x18] sm:$0xff]  ;;  %v171_v42 = vld [vmem:[#allocation11 + $0x20] sm:$0xff]  ;;  %v172_v43 = vld [vmem:[#allocation11 + $0x28] sm:$0xff] }
  0x85   :  { %471 = vmatpush3.bf16.msra.mxu0 %v468_v17  ;;  %477 = vmatprep.subr.bf16.mxu1 %v476_v22  ;;  %v480_v41 = vpack.c.bf16 %v170_v40, %v169_v39  ;;  %v484_v44 = vpack.c.bf16 %v172_v43, %v171_v42  ;;  %v173_v45 = vld [vmem:[#allocation11 + $0x30] sm:$0xff]  ;;  %v174_v46 = vld [vmem:[#allocation11 + $0x38] sm:$0xff]  ;;  %v175_v47 = vld [vmem:[#allocation11 + $0x40] sm:$0xff]  ;;  %p687_p3 = por %p686_p2, %p685_p1 }
  0x86   :  { %121 = vadd.xlane.f32.xlu0 %v120_v3  ;;  %473 = vmatprep.subr.bf16.mxu0 %v472_v19  ;;  %v488_v48 = vpack.c.bf16 %v174_v46, %v173_v45  ;;  %v176_v49 = vld [vmem:[#allocation11 + $0x48] sm:$0xff]  ;;  %v177_v51 = vld [vmem:[#allocation11 + $0x50] sm:$0xff]  ;;  %v178_v52 = vld [vmem:[#allocation11 + $0x58] sm:$0xff] }
  0x87   :  { %479 = vmatpush3.bf16.msra.mxu1 %v476_v22  ;;  %v492_v50 = vpack.c.bf16 %v176_v49, %v175_v47  ;;  %v496_v53 = vpack.c.bf16 %v178_v52, %v177_v51  ;;  %v179_v54 = vld [vmem:[#allocation11 + $0x60] sm:$0xff]  ;;  %v180_v55 = vld [vmem:[#allocation11 + $0x68] sm:$0xff]  ;;  %v181_v57 = vld [vmem:[#allocation11 + $0x70] sm:$0xff]  ;;  %p688_p4 = pnand %p687_p3, %p681_p0 }
  0x88   :  { %481 = vmatprep.subr.bf16.mxu1 %v480_v41  ;;  %v500_v56 = vpack.c.bf16 %v180_v55, %v179_v54  ;;  %v182_v58 = vld [vmem:[#allocation11 + $0x78] sm:$0xff] }
  0x89   :  { %475 = vmatpush3.bf16.msra.mxu0 %v472_v19  ;;  %v504_v59 = vpack.c.bf16 %v182_v58, %v181_v57  ;;  %v394_v60 = vld [vmem:[#allocation10] ss:$0 sm:$0xff]  ;;  %v397_v19 = vld [vmem:[#allocation13] ss:$0 sm:$0xff] }
  0x8b   :  { %483 = vmatpush3.bf16.msra.mxu1 %v480_v41 }
  0x8c   :  { %485 = vmatprep.subr.bf16.mxu1 %v484_v44 }
  0x8f   :  { %487 = vmatpush3.bf16.msra.mxu1 %v484_v44 }
  0x90   :  { %489 = vmatprep.subr.bf16.mxu1 %v488_v48 }
  0x93   :  { %491 = vmatpush3.bf16.msra.mxu1 %v488_v48 }
  0x94   :  { %493 = vmatprep.subr.bf16.mxu1 %v492_v50 }
  0x97   :  { %495 = vmatpush3.bf16.msra.mxu1 %v492_v50 }
  0x98   :  { %497 = vmatprep.subr.bf16.mxu1 %v496_v53 }
  0x9b   :  { %499 = vmatpush3.bf16.msra.mxu1 %v496_v53 }
  0x9c   :  { %501 = vmatprep.subr.bf16.mxu1 %v500_v56 }
  0x9f   :  { %503 = vmatpush3.bf16.msra.mxu1 %v500_v56 }
  0xa0   :  { %505 = vmatprep.subr.bf16.mxu1 %v504_v59 }
  0xa3   :  { %507 = vmatpush3.bf16.msra.mxu1 %v504_v59 }
 0x10f   :  { %v119_v4 = vpop.xlane.xlu0 %118 }
 0x110   :  { %v124_v5 = vmul.f32 0.03125, %v119_v4 }
 0x112   :  { %v126_v6 = vsub.f32 %v114_v0, %v124_v5 }
 0x113   :  { %v122_v7 = vpop.xlane.xlu0 %121 }
 0x114   :  { %v125_v8 = vmul.f32 0.03125, %v122_v7  ;;  %v128_v9 = vmul.f32 %v126_v6, %v126_v6 }
 0x116   :  { %v127_v10 = vsub.f32 %v115_v1, %v125_v8  ;;  %v130_v11 = vsel %vm116_vm0, %v128_v9, 0.0 }
 0x117   :  { %131 = vadd.xlane.f32.xlu1 %v130_v11 }
 0x118   :  { %v129_v12 = vmul.f32 %v127_v10, %v127_v10 }
 0x11a   :  { %v133_v13 = vsel %vm116_vm0, %v129_v12, 0.0 }
 0x11b   :  { %134 = vadd.xlane.f32.xlu1 %v133_v13 }
 0x1a4   :  { %v132_v23 = vpop.xlane.xlu1 %131 }
 0x1a5   :  { %v136_v24 = vmul.f32 0.03125, %v132_v23 }
 0x1a7   :  { %v138_v25 = vadd.f32 1e-06, %v136_v24 }
 0x1a8   :  { %v135_v26 = vpop.xlane.xlu1 %134 }
 0x1a9   :  { %518 = vrsqrt.f32 %v138_v25  ;;  %v137_v27 = vmul.f32 0.03125, %v135_v26 }
 0x1ab   :  { %v139_v28 = vadd.f32 1e-06, %v137_v27 }
 0x1ad   :  { %520 = vrsqrt.f32 %v139_v28 }
 0x1b3   :  { %v519_v29 = vpop.eup %518 }
 0x1b4   :  { %v142_v31 = vmul.f32 %v519_v29, %v126_v6 }
 0x1b6   :  { %v151_v33 = vmul.f32 %v392_v30, %v142_v31 }
 0x1b7   :  { %v521_v34 = vpop.eup %520 }
 0x1b8   :  { %v143_v35 = vmul.f32 %v521_v34, %v127_v10  ;;  %v160_v36 = vadd.f32 %v393_v32, %v151_v33 }
 0x1ba   :  { %v152_v37 = vmul.f32 %v392_v30, %v143_v35  ;;  %430 = vmatprep.mubr.msk.f32.mxu0 %vm116_vm0, %v160_v36 }
 0x1bc   :  { %v161_v38 = vadd.f32 %v393_v32, %v152_v37 }
 0x1be   :  { %431 = vmatmul.mubr.msk.f32.vlgmr.msra.gmra.mrb[0].mxu0 %vm116_vm0, %v161_v38 }
 0x291   :  { %v432_v61 = vpop.f32.mrb[0].mxu0 }
 0x292   :  { %v267_v62 = vadd.f32 %v432_v61, %v394_v60  ;;  %v261_v63 = vpop.f32.mrb[1].mxu0 }
 0x293   :  { %v262_v0 = vadd.f32 %v394_v60, %v261_v63 }
 0x294   :  { %v273_v1 = vmul.f32 0.044715, %v267_v62  ;;  %v271_v16 = vmul.f32 0.5, %v267_v62 }
 0x295   :  { %v272_v2 = vmul.f32 0.044715, %v262_v0  ;;  %v270_v14 = vmul.f32 0.5, %v262_v0 }
 0x296   :  { %v275_v3 = vmul.f32 %v273_v1, %v267_v62 }
 0x297   :  { %v274_v4 = vmul.f32 %v272_v2, %v262_v0 }
 0x298   :  { %v277_v5 = vmul.f32 %v275_v3, %v267_v62 }
 0x299   :  { %v276_v6 = vmul.f32 %v274_v4, %v262_v0 }
 0x29a   :  { %v279_v7 = vadd.f32 %v277_v5, %v267_v62 }
 0x29b   :  { %v278_v8 = vadd.f32 %v276_v6, %v262_v0 }
 0x29c   :  { %v281_v9 = vmul.f32 0.7978846, %v279_v7 }
 0x29d   :  { %v280_v10 = vmul.f32 0.7978846, %v278_v8 }
 0x29e   :  { %522 = vtanh.f32 %v281_v9 }
 0x29f   :  { %524 = vtanh.f32 %v280_v10 }
 0x2a8   :  { %v523_v11 = vpop.eup %522 }
 0x2a9   :  { %v525_v12 = vpop.eup %524  ;;  %v285_v13 = vadd.f32 1.0, %v523_v11 }
 0x2aa   :  { %v284_v15 = vadd.f32 1.0, %v525_v12 }
 0x2ab   :  { %v287_v18 = vmul.f32 %v285_v13, %v271_v16 }
 0x2ac   :  { %v286_v17 = vmul.f32 %v284_v15, %v270_v14 }
 0x2ae   :  { %465 = vmatprep.mubr.f32.mxu1 %v286_v17 }
 0x2af   :  { %466 = vmatmul.mubr.f32.vlgmr.msra.gmra.mrb[0].mxu1 %v287_v18 }
 0x382   :  { %v467_v20 = vpop.f32.mrb[0].mxu1 }
 0x383   :  { %v367_v21 = vadd.f32 %v467_v20, %v397_v19  ;;  %v361_v22 = vpop.f32.mrb[1].mxu1 }
 0x384   :  { %v362_v23 = vadd.f32 %v397_v19, %v361_v22 }
 0x385   :  { %371 = vst [vmem:[#allocation14 + $0x8] sm:$0xff] %v367_v21 }
 0x386   :  { %370 = vst [vmem:[#allocation14] sm:$0xff] %v362_v23 }
 0x387   :  { %691 = shalt.err (!%p688_p4)
}
 0x388   :  { %s692_s20 = scalar_lea.hbm %s883_s7, 256 }
 0x389   :  { %p693_p5 = scmp.ne.s32.totalorder %s883_s7, %s692_s20  ;;  %p696_p6 = scmp.lt.u32.totalorder %s692_s20, %s883_s7 }
 0x38b   :  { %p698_p7 = pnand %p696_p6, %p693_p5 }
 0x38d   :  { %701 = shalt.err (!%p698_p7)
}
 0x38e   :  { %383 = dma.vmem_to_hbm [thread:$0]  %s378_s14, 256, %s883_s7, [#allocation4], %s715_s25, %s715_s25, %s716_s26  }
 0x38f   :  { %710 = dma.done.wait [#allocation4], 256  }
 0x390   :  { %711 = vsyncadd [#allocation4], 4294967040 }
 0x391   :  { %387 = vsyncpa [#allocation3], 1 }
 0x392   :  { %388 = vsyncpa [#allocation6], 1 }
 0x393   :  { %389 = vsyncpa [#allocation9], 1 }
 0x394   :  { %390 = vsyncpa [#allocation12], 1 }
 0x395   :  { %391 = vsyncpa [#allocation4], 1 }

</bundles_post_ra>
